<compile_context>
chip_gen: v7x
topology: tpu7x:2x2x1
jax: 0.10.0
libtpu: 0.0.40
codegen_flags: <defaults>
</compile_context>

<pallas_src>
import math
import functools

import jax
import jax.numpy as jnp
from jax.experimental import pallas as pl
from jax.experimental.pallas import tpu as pltpu

TWO_PI = 2.0 * math.pi


def _round_up(n, m):
    return ((n + m - 1) // m) * m


def _gfp_kernel(x_ref, w_ref, out_ref, *, pack):
    # x_ref  : (tb, pack)       pack batch values per output row
    # w_ref  : (1, H)           W * 2*pi, VMEM-resident across the grid
    # out_ref: (tb, pack*2H)    row layout: [sin_0, cos_0, sin_1, cos_1, ...]
    x = x_ref[...]                       # f32
    w = w_ref[...]                       # f32
    h = w.shape[1]
    # TODO(synk): on v7x (VALU-bound regime) a shared range-reduction sincos
    # (one mod-2pi reduction feeding both polynomials) would cut ~30-40% of
    # VALU ops vs independent jnp.sin / jnp.cos.
    for j in range(pack):
        proj = x[:, j:j + 1] * w         # (tb, H) outer product, f32
        out_ref[:, 2 * h * j:2 * h * j + h] = jnp.sin(proj).astype(out_ref.dtype)
        out_ref[:, 2 * h * j + h:2 * h * (j + 1)] = jnp.cos(proj).astype(out_ref.dtype)


def init_gaussian_fourier_projection(key, embed_dim, scale=30.0):
    """Returns (W, W_premul): W matches torch.randn(embed_dim//2)*scale,
    W_premul has the 2*pi factor folded in once for the kernel."""
    W = jax.random.normal(key, (embed_dim // 2,), dtype=jnp.float32) * scale
    return W, W * TWO_PI


@functools.partial(jax.jit, static_argnames=("out_dtype",))
def gaussian_fourier_projection(x, W_premul, *, out_dtype=jnp.float32):
    """x: (B,) float, W_premul: (H,) = W * 2*pi  ->  (B, 2H) out_dtype."""
    B = x.shape[0]
    H = W_premul.shape[0]
    two_h = 2 * H

    # Pack k batch rows per output row so the store lane-width is 128 when
    # embed_dim < 128 (pure layout plumbing, row-major layout unchanged).
    pack = 1
    if two_h < 128 and 128 % two_h == 0 and B % (128 // two_h) == 0:
        pack = 128 // two_h
    n_rows = B // pack
    width = pack * two_h

    # Tile sizing: ~2 MiB of output per block, capped so the parallel batch
    # axis has >=2 grid steps (v7x has 2 TensorCores sharing that axis).
    itemsize = jnp.dtype(out_dtype).itemsize
    target_block_bytes = 2 << 20
    tb = (target_block_bytes // (width * itemsize)) // 8 * 8
    tb = max(tb, 8)
    tb = min(tb, _round_up(pl.cdiv(n_rows, 2), 8))
    tb = min(tb, _round_up(n_rows, 8))
    if n_rows < 8:
        tb = n_rows  # single full-extent block (legal: equals the array dim)

    x2d = x.astype(jnp.float32).reshape(n_rows, pack)
    w2d = W_premul.astype(jnp.float32).reshape(1, H)

    out = pl.pallas_call(
        functools.partial(_gfp_kernel, pack=pack),
        out_shape=jax.ShapeDtypeStruct((n_rows, width), out_dtype),
        grid=(pl.cdiv(n_rows, tb),),
        in_specs=[
            pl.BlockSpec((tb, pack), lambda i: (i, 0)),  # x marches with the grid
            pl.BlockSpec((1, H), lambda i: (0, 0)),      # W resident (constant map)
        ],
        out_specs=pl.BlockSpec((tb, width), lambda i: (i, 0)),
        compiler_params=pltpu.CompilerParams(
            dimension_semantics=("parallel",),
        ),
    )(x2d, w2d)

    # Free row-major reshape back to the logical (B, embed_dim) view.
    return out.reshape(B, two_h)


def reference(x, W):
    proj = x[:, None] * W[None, :] * TWO_PI
    return jnp.concatenate([jnp.sin(proj), jnp.cos(proj)], axis=-1)


if __name__ == "__main__":
    key = jax.random.PRNGKey(0)
    kw, kx1, kx2, kx3 = jax.random.split(key, 4)

    # Small shapes consistent with the module: timestep embedding of a batch.
    embed_dim = 64          # -> W has shape (32,)
    scale = 30.0
    batch = 8

    W, W_premul = init_gaussian_fourier_projection(kw, embed_dim, scale)
    x = jax.random.uniform(kx1, (batch,), dtype=jnp.float32)

    out = jax.block_until_ready(gaussian_fourier_projection(x, W_premul))
    ref = reference(x, W)
    assert out.shape == (batch, embed_dim), out.shape
    assert jnp.allclose(out, ref, atol=1e-3, rtol=1e-3), "mismatch vs reference"

    # Ragged batch / multi-step grid, lane-packed path (embed_dim < 128).
    x2 = jax.random.uniform(kx2, (200,), dtype=jnp.float32)
    out2 = jax.block_until_ready(gaussian_fourier_projection(x2, W_premul))
    assert out2.shape == (200, embed_dim), out2.shape
    assert jnp.allclose(out2, reference(x2, W), atol=1e-3, rtol=1e-3), "tiled mismatch"

    # Unpacked path (embed_dim >= 128) with bf16 output store (f32 math).
    embed_dim3 = 256
    W3, W3_premul = init_gaussian_fourier_projection(kw, embed_dim3, scale)
    x3 = jax.random.uniform(kx3, (40,), dtype=jnp.float32)
    out3 = jax.block_until_ready(
        gaussian_fourier_projection(x3, W3_premul, out_dtype=jnp.bfloat16))
    assert out3.shape == (40, embed_dim3), out3.shape
    assert jnp.allclose(out3.astype(jnp.float32), reference(x3, W3),
                        atol=2e-2, rtol=2e-2), "bf16 mismatch"

    print("KERNEL_OK")
</pallas_src>

<mosaic_0001>
module attributes {stable_mosaic.version = 11 : i64} {
  func.func @_gfp_kernel(%arg0: i32, %arg1: memref<4x2xf32, #tpu.memory_space<vmem>>, %arg2: memref<1x32xf32, #tpu.memory_space<vmem>>, %arg3: memref<4x128xf32, #tpu.memory_space<vmem>>) attributes {dimension_semantics = [#tpu.dimension_semantics<parallel>], iteration_bounds = array<i64: 1>, scalar_prefetch = 0 : i64, scratch_operands = 0 : i64, tpu.core_type = #tpu.core_type<tc>, window_params = [{transform_indices = @transform_0, window_bounds = array<i64: 4, 2>}, {pipeline_mode = #tpu.pipeline_mode<synchronous>, transform_indices = @transform_1, window_bounds = array<i64: 1, 32>}, {transform_indices = @transform_2, window_bounds = array<i64: 4, 128>}]} {
    %c0 = arith.constant 0 : index
    %c0_0 = arith.constant 0 : index
    %0 = vector.load %arg1[%c0, %c0_0] : memref<4x2xf32, #tpu.memory_space<vmem>>, vector<4x2xf32>
    %c0_1 = arith.constant 0 : index
    %c0_2 = arith.constant 0 : index
    %1 = vector.load %arg2[%c0_1, %c0_2] : memref<1x32xf32, #tpu.memory_space<vmem>>, vector<1x32xf32>
    %2 = vector.extract_strided_slice %0 {offsets = [0, 0], sizes = [4, 1], strides = [1, 1]} : vector<4x2xf32> to vector<4x1xf32>
    %3 = vector.broadcast %2 : vector<4x1xf32> to vector<4x32xf32>
    %4 = vector.broadcast %1 : vector<1x32xf32> to vector<4x32xf32>
    %5 = arith.mulf %3, %4 : vector<4x32xf32>
    %6 = math.sin %5 : vector<4x32xf32>
    %c0_3 = arith.constant 0 : index
    %c0_4 = arith.constant 0 : index
    %7 = vector.load %arg3[%c0_3, %c0_4] : memref<4x128xf32, #tpu.memory_space<vmem>>, vector<4x32xf32>
    tpu.vector_store %arg3[%c0_3, %c0_4], %6 {strides = array<i32>} : memref<4x128xf32, #tpu.memory_space<vmem>>, vector<4x32xf32>,
    %8 = math.cos %5 : vector<4x32xf32>
    %c0_5 = arith.constant 0 : index
    %c32 = arith.constant 32 : index
    %9 = vector.load %arg3[%c0_5, %c32] : memref<4x128xf32, #tpu.memory_space<vmem>>, vector<4x32xf32>
    tpu.vector_store %arg3[%c0_5, %c32], %8 {strides = array<i32>} : memref<4x128xf32, #tpu.memory_space<vmem>>, vector<4x32xf32>,
    %10 = vector.extract_strided_slice %0 {offsets = [0, 1], sizes = [4, 1], strides = [1, 1]} : vector<4x2xf32> to vector<4x1xf32>
    %11 = vector.broadcast %10 : vector<4x1xf32> to vector<4x32xf32>
    %12 = vector.broadcast %1 : vector<1x32xf32> to vector<4x32xf32>
    %13 = arith.mulf %11, %12 : vector<4x32xf32>
    %14 = math.sin %13 : vector<4x32xf32>
    %c0_6 = arith.constant 0 : index
    %c64 = arith.constant 64 : index
    %15 = vector.load %arg3[%c0_6, %c64] : memref<4x128xf32, #tpu.memory_space<vmem>>, vector<4x32xf32>
    tpu.vector_store %arg3[%c0_6, %c64], %14 {strides = array<i32>} : memref<4x128xf32, #tpu.memory_space<vmem>>, vector<4x32xf32>,
    %16 = math.cos %13 : vector<4x32xf32>
    %c0_7 = arith.constant 0 : index
    %c96 = arith.constant 96 : index
    %17 = vector.load %arg3[%c0_7, %c96] : memref<4x128xf32, #tpu.memory_space<vmem>>, vector<4x32xf32>
    tpu.vector_store %arg3[%c0_7, %c96], %16 {strides = array<i32>} : memref<4x128xf32, #tpu.memory_space<vmem>>, vector<4x32xf32>,
    return
  }
  func.func @transform_0(%arg0: i32) -> (i32, i32) {
    %c0_i32 = arith.constant 0 : i32
    %c0_i32_0 = arith.constant 0 : i32
    return %arg0, %c0_i32 : i32, i32
  }
  func.func @transform_1(%arg0: i32) -> (i32, i32) {
    %c0_i32 = arith.constant 0 : i32
    %c0_i32_0 = arith.constant 0 : i32
    %c0_i32_1 = arith.constant 0 : i32
    return %c0_i32, %c0_i32_0 : i32, i32
  }
  func.func @transform_2(%arg0: i32) -> (i32, i32) {
    %c0_i32 = arith.constant 0 : i32
    %c0_i32_0 = arith.constant 0 : i32
    return %arg0, %c0_i32 : i32, i32
  }
}

</mosaic_0001>

<bundles_post_ra>
// kernel: gaussian_fourier_projection.1
= control target key start
LH: loop header
LB: loop body
LE: loop exit
PB: predicated region body
PF: predicated region fallthrough
CT: control target
= control target key end

     0   :  { %v514_v0 = vmov 0   ;;  %v515_v2 = vmov 1   ;;  %v516_v26 = vmov 2102212464   ;;  %v517_v28 = vmov 920167782   ;;  %s650_s0 = inlined_call_operand.vmem [shape: f32[4,2], index: 0, kind: input, shape index: {}]   ;;  %s651_s1 = inlined_call_operand.vmem [shape: f32[1,32], index: 1, kind: input, shape index: {}]   ;;  %s652_s2 = inlined_call_operand.vmem [shape: f32[4,128], index: 2, kind: output, shape index: {}]  }
   0x1   :  { %504 = vset.pattern.permute.xlu0 %v514_v0  ;;  %v11_v1 = vld [vmem:[%s650_s0] sm:$0xf]  ;;  %v518_v32 = vmov 1326507024   ;;  %v519_v36 = vmov 683565275  }
   0x2   :  { %15 = vperm.xlu0 %504, %v11_v1   ;;  %v468_v3 = vld [vmem:[%s651_s1] ss:$0 sm:$0xff]  ;;  %v520_v38 = vmov 2475754826   ;;  %v521_v40 = vmov 2131351028  }
   0x3   :  { %s522_s0 = smov 32   ;;  %s523_s14 = smov 64  }
   0x4   :  { %s524_s15 = smov 96  }
   0x6   :  { %505 = vset.pattern.permute.xlu0 %v515_v2 }
   0x7   :  { %241 = vperm.xlu0 %505, %v11_v1  }
  0x81   :  { %v16_v4 = vpop.permute.xlu0 %15 }
  0x82   :  { %v546_v5 = vmul.f32 %v468_v3, %v16_v4 }
  0x84   :  { %v28_v6 = vand.u32 2139095040, %v546_v5  ;;  %v25_v11 = vand.u32 2147483647, %v546_v5 }
  0x86   :  { %v29_v7 = vshrl.u32 %v28_v6, 23  ;;  %v242_v8 = vpop.permute.xlu0 %241  ;;  %v558_v17 = vand.u32 8388607, %v25_v11 }
  0x87   :  { %v549_v9 = vmul.f32 %v468_v3, %v242_v8 }
  0x88   :  { %v469_v10 = vadd.s32 4294967169, %v29_v7  ;;  %v33_v25 = vor.u32 8388608, %v558_v17 }
  0x89   :  { %v245_v12 = vand.u32 2147483647, %v549_v9  ;;  %v248_v13 = vand.u32 2139095040, %v549_v9  ;;  %vm247_vm14 = vcmp.lt.s32.totalorder %v549_v9, 0 }
  0x8a   :  { %v35_v14 = vadd.s32 1, %v469_v10 }
  0x8b   :  { %v249_v15 = vshrl.u32 %v248_v13, 23  ;;  %v252_v16 = vand.u32 8388607, %v245_v12  ;;  %vm246_vm15 = vcmp.le.f32.partialorder %v245_v12, 0.7853982 }
  0x8c   :  { %vm36_vm0 = vcmp.gt.s32.totalorder %v35_v14, 0 }
  0x8d   :  { %v37_v18 = vsel %vm36_vm0, %v35_v14, 0  ;;  %v477_v19 = vadd.s32 4294967169, %v249_v15  ;;  %v253_v20 = vor.u32 8388608, %v252_v16  ;;  %vm27_vm0 = vcmp.lt.s32.totalorder %v546_v5, 0 }
  0x8e   :  { %v560_v21 = vshrl.u32 %v37_v18, 5  ;;  %v39_v22 = vand.u32 31, %v37_v18 }
  0x8f   :  { %v255_v23 = vadd.s32 1, %v477_v19  ;;  %v565_v30 = vshll.u32 %v253_v20, 8 }
  0x90   :  { %v562_v24 = vsub.s32 32, %v39_v22  ;;  %v51_v27 = vshll.u32 %v516_v26, %v39_v22  ;;  %v54_v29 = vshll.u32 %v517_v28, %v39_v22  ;;  %vm60_vm2 = vcmp.lt.s32.totalorder %v560_v21, 4 }
  0x91   :  { %vm256_vm1 = vcmp.gt.s32.totalorder %v255_v23, 0  ;;  %v42_v37 = vshll.u32 %v519_v36, %v39_v22  ;;  %v45_v39 = vshll.u32 %v520_v38, %v39_v22  ;;  %v48_v41 = vshll.u32 %v521_v40, %v39_v22 }
  0x92   :  { %v52_v31 = vshrl.u32 %v517_v28, %v562_v24  ;;  %v55_v33 = vshrl.u32 %v518_v32, %v562_v24  ;;  %v257_v34 = vsel %vm256_vm1, %v255_v23, 0  ;;  %v43_v44 = vshrl.u32 %v520_v38, %v562_v24 }
  0x93   :  { %v259_v35 = vand.u32 31, %v257_v34  ;;  %v258_v43 = vshrl.u32 %v257_v34, 5  ;;  %v46_v45 = vshrl.u32 %v521_v40, %v562_v24  ;;  %v49_v49 = vshrl.u32 %v516_v26, %v562_v24 }
  0x94   :  { %v53_v42 = vor.u32 %v52_v31, %v51_v27  ;;  %v56_v46 = vor.u32 %v55_v33, %v54_v29  ;;  %vm57_vm3 = vcmp.lt.s32.totalorder %v560_v21, 1  ;;  %v44_v2 = vor.u32 %v43_v44, %v42_v37 }
  0x95   :  { %v260_v47 = vsub.s32 32, %v259_v35  ;;  %v262_v48 = vshll.u32 %v519_v36, %v259_v35  ;;  %v265_v51 = vshll.u32 %v520_v38, %v259_v35  ;;  %v268_v52 = vshll.u32 %v521_v40, %v259_v35 }
  0x96   :  { %v66_v50 = vsel %vm60_vm2, %v53_v42, 920167782  ;;  %v271_v53 = vshll.u32 %v516_v26, %v259_v35  ;;  %v274_v57 = vshll.u32 %v517_v28, %v259_v35  ;;  %vm277_vm4 = vcmp.lt.s32.totalorder %v258_v43, 1 }
  0x97   :  { %v263_v54 = vshrl.u32 %v520_v38, %v260_v47  ;;  %v266_v55 = vshrl.u32 %v521_v40, %v260_v47  ;;  %v269_v56 = vshrl.u32 %v516_v26, %v260_v47  ;;  %v261_v58 = vshrl.u32 %v519_v36, %v260_v47 }
  0x98   :  { %v272_v59 = vshrl.u32 %v517_v28, %v260_v47  ;;  %v275_v60 = vshrl.u32 %v518_v32, %v260_v47  ;;  %vm279_vm5 = vcmp.lt.s32.totalorder %v258_v43, 3  ;;  %vm280_vm6 = vcmp.lt.s32.totalorder %v258_v43, 4 }
  0x99   :  { %v264_v61 = vor.u32 %v263_v54, %v262_v48  ;;  %v267_v62 = vor.u32 %v266_v55, %v265_v51  ;;  %v270_v63 = vor.u32 %v269_v56, %v268_v52  ;;  %v47_v14 = vor.u32 %v46_v45, %v45_v39 }
  0x9a   :  { %v273_v0 = vor.u32 %v272_v59, %v271_v53  ;;  %v276_v1 = vor.u32 %v275_v60, %v274_v57  ;;  %vm278_vm7 = vcmp.lt.s32.totalorder %v258_v43, 2  ;;  %v50_v18 = vor.u32 %v49_v49, %v48_v41 }
  0x9b   :  { %v281_v3 = vsel %vm277_vm4, %v261_v58, %v264_v61  ;;  %v282_v4 = vsel %vm280_vm6, %v270_v63, 2102212464  ;;  %v285_v6 = vsel %vm277_vm4, %v264_v61, %v267_v62  ;;  %v289_v7 = vsel %vm277_vm4, %v267_v62, %v270_v63 }
  0x9c   :  { %v283_v8 = vsel %vm279_vm5, %v267_v62, %v282_v4  ;;  %v286_v10 = vsel %vm280_vm6, %v273_v0, 920167782  ;;  %v290_v13 = vsel %vm280_vm6, %v276_v1, 1326507024  ;;  %v70_v19 = vsel %vm60_vm2, %v56_v46, 1326507024 }
  0x9d   :  { %v287_v15 = vsel %vm279_vm5, %v270_v63, %v286_v10  ;;  %v291_v16 = vsel %vm279_vm5, %v273_v0, %v290_v13  ;;  %v284_v20 = vsel %vm278_vm7, %v281_v3, %v283_v8  ;;  %v41_v31 = vshrl.u32 %v519_v36, %v562_v24 }
  0x9e   :  { %v288_v22 = vsel %vm278_vm7, %v285_v6, %v287_v15  ;;  %v292_v23 = vsel %vm278_vm7, %v289_v7, %v291_v16  ;;  %vm59_vm8 = vcmp.lt.s32.totalorder %v560_v21, 3  ;;  %v62_v32 = vsel %vm60_vm2, %v50_v18, 2102212464 }
  0x9f   :  { %v579_v26 = vmul.u32.u64.low %v565_v30, %v292_v23  ;;  %v580_v27 = vmul.u32.u64.high %v565_v30, %v292_v23, %v579_v26  ;;  %v583_v28 = vmul.u32.u64.low %v565_v30, %v288_v22  ;;  %v584_v29 = vmul.u32.u64.high %v565_v30, %v288_v22, %v583_v28 }
  0xa0   :  { %v65_v33 = vsel %vm57_vm3, %v44_v2, %v47_v14  ;;  %vm58_vm9 = vcmp.lt.s32.totalorder %v560_v21, 2  ;;  %v67_v34 = vsel %vm59_vm8, %v50_v18, %v66_v50  ;;  %v69_v35 = vsel %vm57_vm3, %v47_v14, %v50_v18 }
  0xa1   :  { %v71_v37 = vsel %vm59_vm8, %v53_v42, %v70_v19  ;;  %v300_v24 = vmul.u32 %v565_v30, %v284_v20  ;;  %v68_v36 = vsel %vm58_vm9, %v65_v33, %v67_v34  ;;  %v73_v39 = vshll.u32 %v33_v25, 8 }
  0xa2   :  { %v72_v38 = vsel %vm58_vm9, %v69_v35, %v71_v37  ;;  %vm302_vm10 = vc.u32 %v580_v27, %v583_v28  ;;  %v303_v40 = vadd.s32 1, %v584_v29  ;;  %v61_v41 = vsel %vm57_vm3, %v41_v31, %v44_v2 }
  0xa3   :  { %v63_v42 = vsel %vm59_vm8, %v47_v14, %v62_v32  ;;  %v612_v30 = vmul.u32.u64.low %v73_v39, %v72_v38  ;;  %v613_v43 = vmul.u32.u64.high %v73_v39, %v72_v38, %v612_v30  ;;  %v301_v2 = vadd.s32 %v583_v28, %v580_v27 }
  0xa4   :  { %v615_v44 = vmul.u32.u64.low %v73_v39, %v68_v36  ;;  %v616_v45 = vmul.u32.u64.high %v73_v39, %v68_v36, %v615_v44  ;;  %v304_v46 = vsel %vm302_vm10, %v303_v40, %v584_v29  ;;  %v64_v25 = vsel %vm58_vm9, %v61_v41, %v63_v42 }
  0xa5   :  { %v305_v17 = vadd.s32 %v304_v46, %v300_v24  ;;  %v80_v49 = vmul.u32 %v73_v39, %v64_v25  ;;  %vm26_vm1 = vcmp.le.f32.partialorder %v25_v11, 0.7853982  ;;  %vm129_vm2 = vcmask 257024  }
  0xa6   :  { %vm82_vm11 = vc.u32 %v613_v43, %v615_v44  ;;  %v83_v48 = vadd.s32 1, %v616_v45  ;;  %v81_v16 = vadd.s32 %v615_v44, %v613_v43 }
  0xa7   :  { %v306_v47 = vadd.s32 536870912, %v305_v17 }
  0xa8   :  { %v84_v51 = vsel %vm82_vm11, %v83_v48, %v616_v45 }
  0xa9   :  { %v307_v50 = vshrl.u32 %v306_v47, 30  ;;  %v85_v52 = vadd.s32 %v84_v51, %v80_v49 }
  0xab   :  { %v308_v53 = vshll.u32 %v307_v50, 30  ;;  %v86_v54 = vadd.s32 536870912, %v85_v52  ;;  %v331_v24 = vsub.s32 4, %v307_v50 }
  0xad   :  { %v309_v55 = vsub.s32 %v305_v17, %v308_v53  ;;  %v87_v56 = vshrl.u32 %v86_v54, 30  ;;  %v332_v42 = vsel %vm247_vm14, %v331_v24, %v307_v50 }
  0xae   :  { %v334_v45 = vsel %vm246_vm15, 0, %v332_v42 }
  0xaf   :  { %v311_v57 = vsub.s32 0, %v309_v55  ;;  %v88_v58 = vshll.u32 %v87_v56, 30  ;;  %v111_v39 = vsub.s32 4, %v87_v56  ;;  %v338_v46 = vadd.s32 3, %v334_v45 }
  0xb0   :  { %v448_v11 = vand.u32 3, %v334_v45 }
  0xb1   :  { %v478_v59 = vmin.u32 %v311_v57, %v309_v55  ;;  %v89_v60 = vsub.s32 %v85_v52, %v88_v58  ;;  %v112_v43 = vsel %vm27_vm0, %v111_v39, %v87_v56  ;;  %v339_v48 = vand.u32 3, %v338_v46 }
  0xb2   :  { %v114_v12 = vsel %vm26_vm1, 0, %v112_v43 }
  0xb3   :  { %v313_v21 = vclz %v478_v59  ;;  %v91_v61 = vsub.s32 0, %v89_v60  ;;  %v118_v17 = vadd.s32 3, %v114_v12  ;;  %v224_v49 = vand.u32 3, %v114_v12 }
  0xb4   :  { %vm340_vm3 = vcmp.lt.s32.totalorder %v339_v48, 2  ;;  %vm341_vm5 = vcmp.eq.s32.totalorder %v339_v48, 0  ;;  %vm344_vm6 = vcmp.eq.s32.totalorder %v339_v48, 2 }
  0xb5   :  { %v479_v62 = vadd.s32 4294967294, %v313_v21  ;;  %v470_v63 = vmin.u32 %v91_v61, %v89_v60  ;;  %v119_v50 = vand.u32 3, %v118_v17  ;;  %vm229_vm4 = vcmp.eq.s32.totalorder %v224_v49, 2 }
  0xb6   :  { %vm226_vm9 = vcmp.eq.s32.totalorder %v224_v49, 0  ;;  %vm225_vm11 = vcmp.lt.s32.totalorder %v224_v49, 2 }
  0xb7   :  { %vm480_vm12 = vcmp.lt.s32.totalorder %v479_v62, 0  ;;  %v93_v1 = vclz %v470_v63  ;;  %vm124_vm7 = vcmp.eq.s32.totalorder %v119_v50, 2  ;;  %vm121_vm8 = vcmp.eq.s32.totalorder %v119_v50, 0 }
  0xb8   :  { %v316_v0 = vsel %vm480_vm12, 0, %v479_v62  ;;  %vm120_vm10 = vcmp.lt.s32.totalorder %v119_v50, 2  ;;  %vm117_vm12 = vweird.f32 %v546_v5 }
  0xb9   :  { %v317_v3 = vsub.s32 32, %v316_v0  ;;  %v321_v4 = vsub.s32 4294967266, %v316_v0  ;;  %v471_v6 = vadd.s32 4294967294, %v93_v1  ;;  %v318_v7 = vshll.u32 %v309_v55, %v316_v0 }
  0xbb   :  { %v319_v8 = vshrl.u32 %v301_v2, %v317_v3  ;;  %v322_v10 = vadd.s32 127, %v321_v4  ;;  %vm472_vm13 = vcmp.lt.s32.totalorder %v471_v6, 0 }
  0xbc   :  { %v96_v15 = vsel %vm472_vm13, 0, %v471_v6  ;;  %vm337_vm13 = vweird.f32 %v549_v9 }
  0xbd   :  { %v320_v13 = vor.u32 %v319_v8, %v318_v7  ;;  %v323_v14 = vshll.u32 %v322_v10, 23  ;;  %v97_v18 = vsub.s32 32, %v96_v15  ;;  %v101_v19 = vsub.s32 4294967266, %v96_v15 }
  0xbe   :  { %v98_v22 = vshll.u32 %v89_v60, %v96_v15 }
  0xbf   :  { %v324_v20 = vor.u32 4788187, %v323_v14  ;;  %v99_v23 = vshrl.u32 %v81_v16, %v97_v18  ;;  %v102_v26 = vadd.s32 127, %v101_v19  ;;  %v327_v27 = vcvt.s32.f32 %v320_v13 }
  0xc1   :  { %v325_v29 = vand.u32 2147483647, %v324_v20  ;;  %v100_v28 = vor.u32 %v99_v23, %v98_v22  ;;  %v103_v31 = vshll.u32 %v102_v26, 23 }
  0xc3   :  { %v328_v32 = vmul.f32 %v327_v27, %v325_v29  ;;  %v104_v33 = vor.u32 4788187, %v103_v31  ;;  %v107_v37 = vcvt.s32.f32 %v100_v28 }
  0xc5   :  { %v329_v34 = vxor.u32 2147483648, %v328_v32  ;;  %v105_v35 = vand.u32 2147483647, %v104_v33 }
  0xc7   :  { %v330_v36 = vsel %vm247_vm14, %v329_v34, %v328_v32  ;;  %v108_v38 = vmul.f32 %v107_v37, %v105_v35  ;;  %vm450_vm14 = vcmp.eq.s32.totalorder %v448_v11, 0 }
  0xc8   :  { %v333_v40 = vsel %vm246_vm15, %v549_v9, %v330_v36  ;;  %vm453_vm15 = vcmp.eq.s32.totalorder %v448_v11, 2 }
  0xc9   :  { %506 = vcosq.f32 %v333_v40  ;;  %v109_v41 = vxor.u32 2147483648, %v108_v38 }
  0xca   :  { %508 = vsinq.f32 %v333_v40 }
  0xcb   :  { %v110_v30 = vsel %vm27_vm0, %v109_v41, %v108_v38  ;;  %vm449_vm0 = vcmp.lt.s32.totalorder %v448_v11, 2 }
  0xcc   :  { %v113_v44 = vsel %vm26_vm1, %v546_v5, %v110_v30  ;;  %vm238_vm1 = vcmask 519424  }
  0xcd   :  { %510 = vcosq.f32 %v113_v44 }
  0xce   :  { %512 = vsinq.f32 %v113_v44 }
  0xd3   :  { %v507_v25 = vpop.eup %506 }
  0xd4   :  { %v509_v47 = vpop.eup %508  ;;  %v345_v52 = vxor.u32 2147483648, %v507_v25 }
  0xd5   :  { %v342_v51 = vxor.u32 2147483648, %v509_v47 }
  0xd6   :  { %v346_v58 = vsel %vm344_vm6, %v345_v52, %v509_v47  ;;  %v455_v5 = vsel %vm453_vm15, %v345_v52, %v509_v47 }
  0xd7   :  { %v511_v53 = vpop.eup %510  ;;  %v343_v57 = vsel %vm341_vm5, %v507_v25, %v342_v51  ;;  %v452_v4 = vsel %vm450_vm14, %v507_v25, %v342_v51 }
  0xd8   :  { %v513_v54 = vpop.eup %512  ;;  %v125_v55 = vxor.u32 2147483648, %v511_v53  ;;  %v347_v0 = vsel %vm340_vm3, %v343_v57, %v346_v58  ;;  %v456_v6 = vsel %vm449_vm0, %v452_v4, %v455_v5  ;;  %vm462_vm3 = vcmask 1044224  }
  0xd9   :  { %v122_v56 = vxor.u32 2147483648, %v513_v54  ;;  %v348_v3 = vsel %vm337_vm13, nan, %v347_v0  ;;  %v457_v7 = vsel %vm337_vm13, nan, %v456_v6 }
  0xda   :  { %v231_v59 = vsel %vm229_vm4, %v125_v55, %v513_v54  ;;  %v126_v60 = vsel %vm124_vm7, %v125_v55, %v513_v54 }
  0xdb   :  { %v228_v21 = vsel %vm226_vm9, %v511_v53, %v122_v56  ;;  %v123_v61 = vsel %vm121_vm8, %v511_v53, %v122_v56 }
  0xdc   :  { %v232_v62 = vsel %vm225_vm11, %v228_v21, %v231_v59  ;;  %v127_v63 = vsel %vm120_vm10, %v123_v61, %v126_v60 }
  0xdd   :  { %v233_v1 = vsel %vm117_vm12, nan, %v232_v62  ;;  %v128_v2 = vsel %vm117_vm12, nan, %v127_v63 }
  0xde   :  { %235 = vrot.lane.b32.xlu1 %v233_v1, %s522_s0  ;;  %130 = vst.msk [vmem:[%s652_s2] sm:$0xf] %vm129_vm2, %v128_v2  ;;  %vm353_vm2 = vcmask 781824  }
  0xe2   :  { %350 = vrot.lane.b32.xlu1 %v348_v3, %s523_s14 }
  0xe6   :  { %459 = vrot.lane.b32.xlu1 %v457_v7, %s524_s15 }
 0x150   :  { %v236_v8 = vpop.permute.xlu1 %235 }
 0x151   :  { %239 = vst.msk [vmem:[%s652_s2] sm:$0xf] %vm238_vm1, %v236_v8 }
 0x154   :  { %v351_v9 = vpop.permute.xlu1 %350 }
 0x155   :  { %354 = vst.msk [vmem:[%s652_s2] sm:$0xf] %vm353_vm2, %v351_v9 }
 0x158   :  { %v460_v10 = vpop.permute.xlu1 %459 }
 0x159   :  { %463 = vst.msk [vmem:[%s652_s2] sm:$0xf] %vm462_vm3, %v460_v10 }

</bundles_post_ra>
